<compile_context>
chip_gen: v7x
topology: tpu7x:2x2x1
jax: 0.10.0
libtpu: 0.0.40
codegen_flags: <defaults>
</compile_context>

<pallas_src>
import jax
import jax.numpy as jnp
from jax.experimental import pallas as pl
from jax.experimental.pallas import tpu as pltpu


def _general_attention_kernel(h_ref, wt_ref, b_ref, ann_ref, out_ref):
    # h_ref:   (TB, D)     concatenated last hidden states for TB batch rows
    # wt_ref:  (D, D)      Wa weight, pre-transposed to (in, out)
    # b_ref:   (1, D)      Wa bias
    # ann_ref: (TB, L, D)  annotations
    # out_ref: (TB, W)     packed lane-dense output slab: [context | attention | zero pad]
    tb, l, d = ann_ref.shape
    w = out_ref.shape[-1]

    # q = Wa(h): one MXU matmul over the whole batch tile, full-precision f32 accumulation.
    q = jnp.dot(h_ref[...], wt_ref[...],
                preferred_element_type=jnp.float32,
                precision=jax.lax.Precision.HIGHEST)
    q = q + b_ref[...].astype(jnp.float32)                      # (TB, D) f32

    ann = ann_ref[...]                                          # stored dtype; promoted per-use

    # energy[b, l] = <annotations[b, l, :], q[b, :]>  -> VPU multiply + lane (D) reduce, f32 acc.
    energy = jnp.sum(ann * q[:, None, :], axis=-1)              # (TB, L) f32

    # Exact softmax over L (no approximate reciprocal).
    m = jnp.max(energy, axis=-1, keepdims=True)
    e = jnp.exp(energy - m)
    attn = e / jnp.sum(e, axis=-1, keepdims=True)               # (TB, L) f32

    # context[b, :] = sum_l attn[b, l] * annotations[b, l, :]  -> sublane (L) reduce, f32 acc.
    ctx = jnp.sum(attn[:, :, None] * ann, axis=1)               # (TB, D) f32

    # Pack [context | attention | zero pad] into one lane-dense slab -> single unmasked store.
    pieces = [ctx.astype(out_ref.dtype), attn.astype(out_ref.dtype)]
    pad = w - d - l
    if pad:
        pieces.append(jnp.zeros((tb, pad), out_ref.dtype))
    out_ref[...] = jnp.concatenate(pieces, axis=-1)


def _round_up(x, m):
    return (x + m - 1) // m * m


def _pick_block_b(batch, row_bytes, target_tile_bytes=2 << 20):
    """Rows per grid step: ~1-2 MiB annotations tile, >= 2 grid steps when the batch allows."""
    if batch % 8 != 0:
        return batch                                   # tiny / ragged demo batch: single step
    divisors = [bb for bb in range(8, batch + 1, 8) if batch % bb == 0]
    if not divisors:
        return batch
    min_steps = 4 if batch // 8 >= 4 else (2 if batch // 8 >= 2 else 1)
    good = [bb for bb in divisors
            if bb * row_bytes <= target_tile_bytes and batch // bb >= min_steps]
    if good:
        return max(good)
    capped = [bb for bb in divisors if batch // bb >= min_steps]
    return min(capped) if capped else batch


def general_attention(hidden, annotations, Wa_weight, Wa_bias, bi_factor,
                      *, block_b=None, compute_dtype=None):
    """hidden: (num_layers*bi_factor, B, H); annotations: (B, L, D) with D = bi_factor*H.

    Returns (context (B, 1, D), attention (B, L, 1)) matching the PyTorch forward.
    block_b: batch rows per grid step (None -> auto: ~1-2 MiB annotation tile, multi-step grid).
    compute_dtype: optionally cast annotations / weight / hidden (e.g. jnp.bfloat16) to halve
                   HBM traffic; accumulation stays f32.
    """
    B, L, D = annotations.shape
    H = hidden.shape[-1]
    assert D == bi_factor * H

    # concat_hidden_states(hidden[-bi_factor:]) -> (B, bi_factor*H) = (B, D)
    hc = jnp.transpose(hidden[-bi_factor:], (1, 0, 2)).reshape(B, D)
    wt = Wa_weight.T                      # (in, out) so q = hc @ wt + b == nn.Linear
    b = Wa_bias.reshape(1, D)

    out_dtype = annotations.dtype
    ann = annotations
    if compute_dtype is not None:
        ann = ann.astype(compute_dtype)
        wt = wt.astype(compute_dtype)
        hc = hc.astype(compute_dtype)
        b = b.astype(compute_dtype)

    ann_itemsize = jnp.dtype(ann.dtype).itemsize
    row_bytes = L * D * ann_itemsize
    if block_b is None:
        block_b = _pick_block_b(B, row_bytes)
    assert B % block_b == 0 and (block_b == B or block_b % 8 == 0), \
        "block_b must divide B and be the full batch or a multiple of 8"
    grid = (B // block_b,)

    # Lane-dense packed output slab width (multiple of 128 lanes).
    W = max(128, _round_up(D + L, 128))

    # VMEM budget: double-buffered tiles + f32 temporaries, with headroom.
    tile_bytes = (block_b * row_bytes                                   # annotations tile
                  + block_b * D * jnp.dtype(hc.dtype).itemsize          # hc tile
                  + (D * D + D) * jnp.dtype(wt.dtype).itemsize          # weight + bias
                  + block_b * W * jnp.dtype(out_dtype).itemsize)        # packed output tile
    temp_bytes = block_b * (L * D + 3 * L + 2 * D + W) * 4              # in-kernel f32 temps
    vmem_limit = int(min(100 * 2**20,
                         max(32 * 2**20, 2 * tile_bytes + temp_bytes + 4 * 2**20)))

    packed = pl.pallas_call(
        _general_attention_kernel,
        grid=grid,
        in_specs=[
            pl.BlockSpec((block_b, D), lambda i: (i, 0)),        # hc
            pl.BlockSpec((D, D), lambda i: (0, 0)),              # Wa weight (transposed)
            pl.BlockSpec((1, D), lambda i: (0, 0)),              # Wa bias
            pl.BlockSpec((block_b, L, D), lambda i: (i, 0, 0)),  # annotations
        ],
        out_specs=pl.BlockSpec((block_b, W), lambda i: (i, 0)),  # [ctx | attn | pad]
        out_shape=jax.ShapeDtypeStruct((B, W), out_dtype),
        compiler_params=pltpu.CompilerParams(
            dimension_semantics=("parallel",),
            vmem_limit_bytes=vmem_limit),
    )(hc, wt, b, ann)

    # Split the packed slab back into PyTorch shapes: context (B,1,D), attention (B,L,1).
    ctx = packed[:, :D][:, None, :]
    att = packed[:, D:D + L][:, :, None]
    return ctx, att


if __name__ == "__main__":
    # Module hyperparameters (small, consistent with the forward pass)
    hidden_size = 32
    num_layers = 2
    bidirectional = True
    bi_factor = 2 if bidirectional else 1
    max_length = 8
    batch_size = 2
    D = bi_factor * hidden_size

    key = jax.random.PRNGKey(0)
    k1, k2, k3, k4 = jax.random.split(key, 4)

    # hidden: (num_layers*bi_factor, B, H) as produced by a (bi)LSTM/GRU
    hidden = jax.random.normal(k1, (num_layers * bi_factor, batch_size, hidden_size),
                               dtype=jnp.float32)
    # annotations: (B, L, D)
    annotations = jax.random.normal(k2, (batch_size, max_length, D), dtype=jnp.float32)

    # Deterministic Wa = nn.Linear(D, D) parameters (PyTorch-style uniform init bound)
    bound = 1.0 / (D ** 0.5)
    Wa_weight = jax.random.uniform(k3, (D, D), jnp.float32, -bound, bound)   # (out, in)
    Wa_bias = jax.random.uniform(k4, (D,), jnp.float32, -bound, bound)

    ctx, att = general_attention(hidden, annotations, Wa_weight, Wa_bias, bi_factor)
    ctx, att = jax.block_until_ready((ctx, att))

    # Pure-JAX reference (same semantics as the PyTorch forward), full f32 precision.
    hp = jax.lax.Precision.HIGHEST
    hc = jnp.transpose(hidden[-bi_factor:], (1, 0, 2)).reshape(batch_size, D)
    q_ref = jnp.dot(hc, Wa_weight.T, precision=hp) + Wa_bias
    energy_ref = jnp.einsum("bld,bd->bl", annotations, q_ref, precision=hp)
    attn_ref = jax.nn.softmax(energy_ref, axis=1)
    ctx_ref = jnp.einsum("bl,bld->bd", attn_ref, annotations, precision=hp)[:, None, :]

    assert ctx.shape == (batch_size, 1, D)
    assert att.shape == (batch_size, max_length, 1)
    assert jnp.allclose(ctx, ctx_ref, atol=2e-3, rtol=2e-3), \
        f"context mismatch: max abs err {jnp.max(jnp.abs(ctx - ctx_ref))}"
    assert jnp.allclose(att[..., 0], attn_ref, atol=2e-3, rtol=2e-3), \
        f"attention mismatch: max abs err {jnp.max(jnp.abs(att[..., 0] - attn_ref))}"

    print("KERNEL_OK")
</pallas_src>

<mosaic_0001>
module attributes {stable_mosaic.version = 11 : i64} {
  func.func @_general_attention_kernel(%arg0: i32, %arg1: memref<2x64xf32, #tpu.memory_space<vmem>>, %arg2: memref<64x64xf32, #tpu.memory_space<vmem>>, %arg3: memref<1x64xf32, #tpu.memory_space<vmem>>, %arg4: memref<2x8x64xf32, #tpu.memory_space<vmem>>, %arg5: memref<2x128xf32, #tpu.memory_space<vmem>>) attributes {dimension_semantics = [#tpu.dimension_semantics<parallel>], iteration_bounds = array<i64: 1>, scalar_prefetch = 0 : i64, scratch_operands = 0 : i64, tpu.core_type = #tpu.core_type<tc>, window_params = [{transform_indices = @transform_0, window_bounds = array<i64: 2, 64>}, {pipeline_mode = #tpu.pipeline_mode<synchronous>, transform_indices = @transform_1, window_bounds = array<i64: 64, 64>}, {pipeline_mode = #tpu.pipeline_mode<synchronous>, transform_indices = @transform_2, window_bounds = array<i64: 1, 64>}, {transform_indices = @transform_3, window_bounds = array<i64: 2, 8, 64>}, {transform_indices = @transform_4, window_bounds = array<i64: 2, 128>}]} {
    %c0 = arith.constant 0 : index
    %c0_0 = arith.constant 0 : index
    %0 = vector.load %arg1[%c0, %c0_0] : memref<2x64xf32, #tpu.memory_space<vmem>>, vector<2x64xf32>
    %c0_1 = arith.constant 0 : index
    %c0_2 = arith.constant 0 : index
    %1 = vector.load %arg2[%c0_1, %c0_2] : memref<64x64xf32, #tpu.memory_space<vmem>>, vector<64x64xf32>
    %cst = arith.constant dense<0.000000e+00> : vector<2x64xf32>
    %2 = tpu.matmul %0, %1, %cst {dimension_numbers = #tpu.dot_dimension_numbers<[1], [0], [0], [1], [0, 0, 1, 1], [], []>, precision = #tpu.contract_precision<fp32>} : vector<2x64xf32>, vector<64x64xf32>, vector<2x64xf32> -> vector<2x64xf32>
    %c0_3 = arith.constant 0 : index
    %c0_4 = arith.constant 0 : index
    %3 = vector.load %arg3[%c0_3, %c0_4] : memref<1x64xf32, #tpu.memory_space<vmem>>, vector<1x64xf32>
    %4 = vector.broadcast %3 : vector<1x64xf32> to vector<2x64xf32>
    %5 = arith.addf %2, %4 : vector<2x64xf32>
    %c0_5 = arith.constant 0 : index
    %c0_6 = arith.constant 0 : index
    %c0_7 = arith.constant 0 : index
    %6 = vector.load %arg4[%c0_5, %c0_6, %c0_7] : memref<2x8x64xf32, #tpu.memory_space<vmem>>, vector<2x8x64xf32>
    %7 = vector.shape_cast %5 : vector<2x64xf32> to vector<2x1x64xf32>
    %8 = vector.broadcast %7 : vector<2x1x64xf32> to vector<2x8x64xf32>
    %9 = arith.mulf %6, %8 : vector<2x8x64xf32>
    %cst_8 = arith.constant dense<0.000000e+00> : vector<2x8xf32>
    %10 = vector.multi_reduction <add>, %9, %cst_8 [2] : vector<2x8x64xf32> to vector<2x8xf32>
    %cst_9 = arith.constant dense<0xFF800000> : vector<2xf32>
    %11 = vector.multi_reduction <maximumf>, %10, %cst_9 [1] : vector<2x8xf32> to vector<2xf32>
    %12 = vector.shape_cast %11 : vector<2xf32> to vector<2x1xf32>
    %13 = vector.broadcast %12 : vector<2x1xf32> to vector<2x8xf32>
    %14 = arith.subf %10, %13 : vector<2x8xf32>
    %15 = math.exp %14 : vector<2x8xf32>
    %cst_10 = arith.constant dense<0.000000e+00> : vector<2xf32>
    %16 = vector.multi_reduction <add>, %15, %cst_10 [1] : vector<2x8xf32> to vector<2xf32>
    %17 = vector.shape_cast %16 : vector<2xf32> to vector<2x1xf32>
    %18 = vector.broadcast %17 : vector<2x1xf32> to vector<2x8xf32>
    %19 = arith.divf %15, %18 : vector<2x8xf32>
    %20 = vector.shape_cast %19 : vector<2x8xf32> to vector<2x8x1xf32>
    %21 = vector.broadcast %20 : vector<2x8x1xf32> to vector<2x8x64xf32>
    %22 = arith.mulf %21, %6 : vector<2x8x64xf32>
    %cst_11 = arith.constant dense<0.000000e+00> : vector<2x64xf32>
    %23 = vector.multi_reduction <add>, %22, %cst_11 [1] : vector<2x8x64xf32> to vector<2x64xf32>
    %cst_12 = arith.constant 0.000000e+00 : f32
    %24 = vector.broadcast %cst_12 : f32 to vector<2x56xf32>
    %25 = tpu.concatenate %23, %19, %24 in 1 : vector<2x64xf32>, vector<2x8xf32>, vector<2x56xf32> -> vector<2x128xf32>
    %c0_13 = arith.constant 0 : index
    %c0_14 = arith.constant 0 : index
    %26 = vector.load %arg5[%c0_13, %c0_14] : memref<2x128xf32, #tpu.memory_space<vmem>>, vector<2x128xf32>
    tpu.vector_store %arg5[%c0_13, %c0_14], %25 {strides = array<i32>} : memref<2x128xf32, #tpu.memory_space<vmem>>, vector<2x128xf32>,
    return
  }
  func.func @transform_0(%arg0: i32) -> (i32, i32) {
    %c0_i32 = arith.constant 0 : i32
    %c0_i32_0 = arith.constant 0 : i32
    return %arg0, %c0_i32 : i32, i32
  }
  func.func @transform_1(%arg0: i32) -> (i32, i32) {
    %c0_i32 = arith.constant 0 : i32
    %c0_i32_0 = arith.constant 0 : i32
    %c0_i32_1 = arith.constant 0 : i32
    return %c0_i32, %c0_i32_0 : i32, i32
  }
  func.func @transform_2(%arg0: i32) -> (i32, i32) {
    %c0_i32 = arith.constant 0 : i32
    %c0_i32_0 = arith.constant 0 : i32
    %c0_i32_1 = arith.constant 0 : i32
    return %c0_i32, %c0_i32_0 : i32, i32
  }
  func.func @transform_3(%arg0: i32) -> (i32, i32, i32) {
    %c0_i32 = arith.constant 0 : i32
    %c0_i32_0 = arith.constant 0 : i32
    %c0_i32_1 = arith.constant 0 : i32
    return %arg0, %c0_i32, %c0_i32_0 : i32, i32, i32
  }
  func.func @transform_4(%arg0: i32) -> (i32, i32) {
    %c0_i32 = arith.constant 0 : i32
    %c0_i32_0 = arith.constant 0 : i32
    return %arg0, %c0_i32 : i32, i32
  }
}

</mosaic_0001>

<bundles_post_ra>
// kernel: tpu_custom_call.1
= control target key start
LH: loop header
LB: loop body
LE: loop exit
PB: predicated region body
PF: predicated region fallthrough
CT: control target
= control target key end

     0   :  { %9 = vsyncpa [#allocation3], 0  ;;  %s1375_s0 = inlined_call_operand.hbm [shape: f32[2,64], index: 0, kind: input, shape index: {}]   ;;  %s1376_s1 = inlined_call_operand.hbm [shape: f32[64,64], index: 1, kind: input, shape index: {}]   ;;  %s1377_s2 = inlined_call_operand.vmem [shape: f32[1,64], index: 2, kind: input, shape index: {}]   ;;  %s1378_s3 = inlined_call_operand.hbm [shape: f32[2,8,64], index: 3, kind: input, shape index: {}]   ;;  %s1379_s4 = inlined_call_operand.hbm [shape: f32[2,128], index: 4, kind: output, shape index: {}]  }
   0x1   :  { %10 = vsyncpa [#allocation6], 0 }
   0x2   :  { %11 = vsyncpa [#allocation4], 0  ;;  %s1156_s15 = smov [#allocation5]   ;;  %s1062_s19 = scalar_lea.hbm %s1376_s1, 1024 }
   0x3   :  { %s27_s16 = sshll.u32 %s1156_s15, 4  ;;  %p1063_p0 = scmp.ne.s32.totalorder %s1376_s1, %s1062_s19  ;;  %s28_s16 = int_to_ptr.vmem [resolvable:$true] %s27_s16 }
   0x4   :  { %p1066_p1 = scmp.lt.u32.totalorder %s1062_s19, %s1376_s1 }
   0x6   :  { %p1068_p2 = pnand %p1066_p1, %p1063_p0 }
   0x8   :  { %1071 = shalt.err (!%p1068_p2)
}
   0x9   :  { %s1072_s24 = scalar_lea.vmem %s28_s16, 1024  ;;  %p1077_p4 = scmp.lt.s32.totalorder %s28_s16, %s28_s16 }
   0xa   :  { %p1073_p3 = scmp.ne.s32.totalorder %s28_s16, %s1072_s24  ;;  %p1078_p5 = scmp.lt.s32.totalorder %s1072_s24, %s1072_s24 }
   0xc   :  { %p1079_p6 = por %p1078_p5, %p1077_p4 }
   0xe   :  { %p1080_p7 = pnand %p1079_p6, %p1073_p3 }
  0x10   :  { %1083 = shalt.err (!%p1080_p7)
}
  0x11   :  { %s1157_s25 = smov 128   ;;  %s1158_s26 = smov 8  }
  0x12   :  { %33 = dma.hbm_to_vmem [thread:$0]  %s1376_s1, 1024, %s28_s16, [#allocation6], %s1157_s25, %s1157_s25, %s1158_s26  }
  0x13   :  { %s1159_s29 = smov [#allocation2]   ;;  %s1160_s5 = smov [#allocation7]  }
  0x14   :  { %s18_s30 = sshll.u32 %s1159_s29, 4  ;;  %s41_s6 = sshll.u32 %s1160_s5, 4  ;;  %s19_s30 = int_to_ptr.vmem [resolvable:$true] %s18_s30  ;;  %s42_s6 = int_to_ptr.vmem [resolvable:$true] %s41_s6 }
  0x15   :  { %s1084_s9 = scalar_lea.hbm %s1375_s0, 32 }
  0x16   :  { %p1085_p8 = scmp.ne.s32.totalorder %s1375_s0, %s1084_s9  ;;  %p1088_p9 = scmp.lt.u32.totalorder %s1084_s9, %s1375_s0 }
  0x18   :  { %p1090_p10 = pnand %p1088_p9, %p1085_p8 }
  0x1a   :  { %1093 = shalt.err (!%p1090_p10)
}
  0x1b   :  { %s1094_s1 = scalar_lea.vmem %s19_s30, 32  ;;  %p1099_p12 = scmp.lt.s32.totalorder %s19_s30, %s19_s30 }
  0x1c   :  { %p1095_p11 = scmp.ne.s32.totalorder %s19_s30, %s1094_s1  ;;  %p1100_p13 = scmp.lt.s32.totalorder %s1094_s1, %s1094_s1 }
  0x1e   :  { %p1101_p0 = por %p1100_p13, %p1099_p12 }
  0x20   :  { %p1102_p1 = pnand %p1101_p0, %p1095_p11 }
  0x22   :  { %1105 = shalt.err (!%p1102_p1)
}
  0x23   :  { %21 = dma.hbm_to_vmem [thread:$0]  %s1375_s0, 32, %s19_s30, [#allocation3]  }
  0x24   :  { %s1106_s18 = scalar_lea.hbm %s1378_s3, 256 }
  0x25   :  { %p1107_p2 = scmp.ne.s32.totalorder %s1378_s3, %s1106_s18  ;;  %p1110_p3 = scmp.lt.u32.totalorder %s1106_s18, %s1378_s3 }
  0x27   :  { %p1112_p4 = pnand %p1110_p3, %p1107_p2 }
  0x29   :  { %1115 = shalt.err (!%p1112_p4)
}
  0x2a   :  { %s1116_s23 = scalar_lea.vmem %s42_s6, 256  ;;  %p1121_p6 = scmp.lt.s32.totalorder %s42_s6, %s42_s6 }
  0x2b   :  { %p1117_p5 = scmp.ne.s32.totalorder %s42_s6, %s1116_s23  ;;  %p1122_p7 = scmp.lt.s32.totalorder %s1116_s23, %s1116_s23 }
  0x2d   :  { %p1123_p8 = por %p1122_p7, %p1121_p6 }
  0x2f   :  { %p1124_p9 = pnand %p1123_p8, %p1117_p5 }
  0x31   :  { %1127 = shalt.err (!%p1124_p9)
}
  0x32   :  { %47 = dma.hbm_to_vmem [thread:$0]  %s1378_s3, 256, %s42_s6, [#allocation6], %s1157_s25, %s1157_s25, %s1158_s26  }
  0x33   :  { %1150 = dma.done.wait [#allocation3], 32  }
  0x34   :  { %1151 = vsyncadd [#allocation3], 4294967264 }
  0x35   :  { %1152 = dma.done.wait [#allocation6], 1280  }
  0x36   :  { %1153 = vsyncadd [#allocation6], 4294966016  ;;  %v1161_v0 = vmov 0.0|0.0   ;;  %vm1162_vm0 = vmmov 0   ;;  %v1163_v1 = vmov 0.0   ;;  %v58_v2 = vld [vmem:[#allocation5] sm:$0xff] }
  0x37   :  { %959 = vmatprep.subr.bf16.mxu1 %v1161_v0  ;;  %995 = vmatprep.subr.bf16.mxu0 %v1161_v0  ;;  %v59_v3 = vld [vmem:[#allocation5 + $0x8] sm:$0xff]  ;;  %v60_v4 = vld [vmem:[#allocation5 + $0x10] sm:$0xff]  ;;  %v78_v5 = vand.u32 4294901760, %v58_v2  ;;  %v61_v7 = vld [vmem:[#allocation5 + $0x18] sm:$0xff]  ;;  %vm73_vm1 = vcmask 523264   ;;  %vm669_vm2 = vcmask 1041409  }
  0x38   :  { %861 = vmatprep.mubr.msk.f32.mxu1 %vm1162_vm0, %v1163_v1  ;;  %918 = vmatprep.mubr.msk.f32.mxu0 %vm1162_vm0, %v1163_v1  ;;  %v81_v6 = vand.u32 4294901760, %v59_v3  ;;  %v84_v8 = vand.u32 4294901760, %v60_v4  ;;  %v62_v9 = vld [vmem:[#allocation5 + $0x20] sm:$0xff]  ;;  %v63_v10 = vld [vmem:[#allocation5 + $0x28] sm:$0xff]  ;;  %v87_v11 = vand.u32 4294901760, %v61_v7  ;;  %v64_v20 = vld [vmem:[#allocation5 + $0x30] sm:$0xff] }
  0x39   :  { %v90_v12 = vand.u32 4294901760, %v62_v9  ;;  %v1242_v14 = vsub.f32 %v58_v2, %v78_v5  ;;  %v93_v16 = vand.u32 4294901760, %v63_v10  ;;  %v57_v17 = vld [vmem:[#allocation2] sm:$0x3]  ;;  %v96_v28 = vand.u32 4294901760, %v64_v20 }
  0x3a   :  { %v1240_v13 = vpack.c.bf16 %v81_v6, %v78_v5  ;;  %v1244_v15 = vsub.f32 %v59_v3, %v81_v6  ;;  %v1246_v18 = vsub.f32 %v60_v4, %v84_v8  ;;  %v1248_v19 = vsub.f32 %v61_v7, %v87_v11  ;;  %v65_v21 = vld [vmem:[#allocation5 + $0x38] sm:$0xff] }
  0x3b   :  { %v1252_v22 = vpack.c.bf16 %v87_v11, %v84_v8  ;;  %v75_v23 = vsel %vm73_vm1, %v57_v17, 0  ;;  %v163_v25 = vand.u32 4294901760, %v1242_v14  ;;  %v1261_v27 = vpack.c.bf16 %v93_v16, %v90_v12 }
  0x3c   :  { %961 = vmatpush3.bf16.msra.mxu1 %v1240_v13  ;;  %997 = vmatpush3.bf16.msra.mxu0 %v1240_v13  ;;  %v1257_v24 = vand.u32 4294901760, %v75_v23  ;;  %v170_v26 = vand.u32 4294901760, %v1244_v15  ;;  %v99_v29 = vand.u32 4294901760, %v65_v21  ;;  %v1263_v30 = vsub.f32 %v62_v9, %v90_v12 }
  0x3d   :  { %962 = vmatprep.subr.bf16.mxu1 %v1161_v0  ;;  %998 = vmatprep.subr.bf16.mxu0 %v1161_v0  ;;  %v177_v32 = vand.u32 4294901760, %v1246_v18  ;;  %v184_v33 = vand.u32 4294901760, %v1248_v19  ;;  %v1272_v34 = vsub.f32 %v63_v10, %v93_v16  ;;  %v164_v35 = vsub.f32 %v1242_v14, %v163_v25 }
  0x3e   :  { %v1266_v31 = vsub.f32 %v75_v23, %v1257_v24  ;;  %v171_v36 = vsub.f32 %v1244_v15, %v170_v26  ;;  %v1279_v38 = vpack.c.bf16 %v99_v29, %v96_v28  ;;  %v1281_v39 = vsub.f32 %v64_v20, %v96_v28 }
  0x3f   :  { %v178_v41 = vsub.f32 %v1246_v18, %v177_v32  ;;  %v185_v42 = vsub.f32 %v1248_v19, %v184_v33  ;;  %v191_v43 = vand.u32 4294901760, %v1263_v30  ;;  %v1289_v44 = vsub.f32 %v65_v21, %v99_v29  ;;  %v615_v29 = vld [vmem:[#allocation7 + $0x8] sm:$0xff] }
  0x40   :  { %964 = vmatpush3.bf16.msra.mxu1 %v1252_v22  ;;  %1000 = vmatpush3.bf16.msra.mxu0 %v1252_v22  ;;  %v152_v37 = vand.u32 4294901760, %v1266_v31  ;;  %v165_v45 = vand.u32 4294901760, %v164_v35  ;;  %v172_v46 = vand.u32 4294901760, %v171_v36  ;;  %v198_v47 = vand.u32 4294901760, %v1272_v34 }
  0x41   :  { %965 = vmatprep.subr.bf16.mxu1 %v1161_v0  ;;  %1001 = vmatprep.subr.bf16.mxu0 %v1161_v0  ;;  %v1008_v48 = vpack.c.bf16 %v170_v26, %v163_v25  ;;  %v179_v50 = vand.u32 4294901760, %v178_v41  ;;  %v186_v51 = vand.u32 4294901760, %v185_v42  ;;  %v192_v52 = vsub.f32 %v1263_v30, %v191_v43  ;;  %v614_v26 = vld [vmem:[#allocation7] sm:$0xff] }
  0x42   :  { %v153_v40 = vsub.f32 %v1266_v31, %v152_v37  ;;  %v972_v53 = vpack.c.bf16 %v172_v46, %v165_v45  ;;  %v199_v54 = vsub.f32 %v1272_v34, %v198_v47  ;;  %v205_v55 = vand.u32 4294901760, %v1281_v39 }
  0x43   :  { %v212_v56 = vand.u32 4294901760, %v1289_v44  ;;  %v975_v57 = vpack.c.bf16 %v186_v51, %v179_v50  ;;  %v1011_v58 = vpack.c.bf16 %v184_v33, %v177_v32  ;;  %v193_v59 = vand.u32 4294901760, %v192_v52 }
  0x44   :  { %967 = vmatpush3.bf16.msra.mxu1 %v1261_v27  ;;  %1003 = vmatpush3.bf16.msra.mxu0 %v1261_v27  ;;  %v154_v49 = vand.u32 4294901760, %v153_v40  ;;  %v200_v60 = vand.u32 4294901760, %v199_v54  ;;  %v206_v61 = vsub.f32 %v1281_v39, %v205_v55  ;;  %v1014_v2 = vpack.c.bf16 %v198_v47, %v191_v43 }
  0x45   :  { %968 = vmatprep.subr.bf16.mxu1 %v1161_v0  ;;  %1004 = vmatprep.subr.bf16.mxu0 %v1161_v0  ;;  %v213_v62 = vsub.f32 %v1289_v44, %v212_v56  ;;  %v1017_v6 = vpack.c.bf16 %v212_v56, %v205_v55  ;;  %v984_v7 = vpack.c.bf16 %v1244_v15, %v1242_v14  ;;  %v620_v12 = vlaneseq  ;;  %v790_v15 = vld [vmem:[%s1377_s2] ss:$0 sm:$0xff]  ;;  %s1166_s2 = smov [#allocation8]  }
  0x46   :  { %v978_v63 = vpack.c.bf16 %v200_v60, %v193_v59  ;;  %v207_v3 = vand.u32 4294901760, %v206_v61  ;;  %v987_v8 = vpack.c.bf16 %v1248_v19, %v1246_v18  ;;  %v990_v9 = vpack.c.bf16 %v1272_v34, %v1263_v30  ;;  %s780_s26 = sshll.u32 %s1166_s2, 4  ;;  %s781_s26 = int_to_ptr.vmem [resolvable:$true] %s780_s26 }
  0x47   :  { %v214_v4 = vand.u32 4294901760, %v213_v62  ;;  %v993_v10 = vpack.c.bf16 %v1289_v44, %v1281_v39  ;;  %v1342_v14 = vshrl.u32 %v620_v12, 7  ;;  %v660_v35 = vand.u32 127, %v620_v12  ;;  %s1128_s27 = scalar_lea.vmem %s781_s26, 32  ;;  %p1133_p11 = scmp.lt.s32.totalorder %s781_s26, %s781_s26 }
  0x48   :  { %970 = vmatpush3.bf16.msra.mxu1 %v1279_v38  ;;  %1006 = vmatpush3.bf16.msra.mxu0 %v1279_v38  ;;  %vm672_vm3 = vcmask 58368   ;;  %v1165_v43 = vmov 0   ;;  %vm771_vm4 = vcmask 588800   ;;  %p1129_p10 = scmp.ne.s32.totalorder %s781_s26, %s1128_s27  ;;  %p1134_p12 = scmp.lt.s32.totalorder %s1128_s27, %s1128_s27 }
  0x49   :  { %971 = vmatprep.subr.bf16.mxu1 %v1161_v0  ;;  %1007 = vmatprep.subr.bf16.mxu0 %v1161_v0  ;;  %v981_v5 = vpack.c.bf16 %v214_v4, %v207_v3  ;;  %v641_v23 = vsub.s32 0, %v1342_v14  ;;  %v683_v44 = vsub.s32 1, %v1342_v14 }
  0x4a   :  { %1053 = vset.pattern.permute.xlu0 %v1165_v43  ;;  %1052 = vset.pattern.permute.xlu1 %v1165_v43  ;;  %p1135_p13 = por %p1134_p12, %p1133_p11 }
  0x4b   :  { %862 = vmatmul.mubr.f32.vlgmr.msra.gmra.mrb[0].mxu1 %v154_v49  ;;  %919 = vmatmul.mubr.f32.vlgmr.msra.gmra.mrb[0].mxu0 %v152_v37  ;;  %v663_v37 = vsub.s32 %v660_v35, %v1342_v14 }
  0x4c   :  { %973 = vmatpush3.bf16.msra.mxu1 %v972_v53  ;;  %1009 = vmatpush3.bf16.msra.mxu0 %v1008_v48  ;;  %p1136_p0 = pnand %p1135_p13, %p1129_p10 }
  0x4d   :  { %974 = vmatprep.subr.bf16.mxu1 %v1161_v0  ;;  %1010 = vmatprep.subr.bf16.mxu0 %v1161_v0 }
  0x4e   :  { %880 = vmatprep.mubr.msk.f32.mxu1 %vm1162_vm0, %v1163_v1  ;;  %937 = vmatprep.mubr.msk.f32.mxu0 %vm1162_vm0, %v1163_v1 }
  0x50   :  { %976 = vmatpush3.bf16.msra.mxu1 %v975_v57  ;;  %1012 = vmatpush3.bf16.msra.mxu0 %v1011_v58 }
  0x51   :  { %977 = vmatprep.subr.bf16.mxu1 %v1161_v0  ;;  %1013 = vmatprep.subr.bf16.mxu0 %v1161_v0 }
  0x54   :  { %979 = vmatpush3.bf16.msra.mxu1 %v978_v63  ;;  %1015 = vmatpush3.bf16.msra.mxu0 %v1014_v2 }
  0x55   :  { %980 = vmatprep.subr.bf16.mxu1 %v1161_v0  ;;  %1016 = vmatprep.subr.bf16.mxu0 %v1161_v0 }
  0x58   :  { %982 = vmatpush3.bf16.msra.mxu1 %v981_v5  ;;  %1018 = vmatpush3.bf16.msra.mxu0 %v1017_v6 }
  0x59   :  { %983 = vmatprep.subr.bf16.mxu1 %v1161_v0  ;;  %1019 = vmatprep.subr.bf16.mxu0 %v1161_v0 }
  0x5b   :  { %881 = vmatmul.mubr.f32.vlgmr.msra.gmra.mrb[0].mxu1 %v1257_v24  ;;  %938 = vmatmul.mubr.f32.vlgmr.msra.gmra.mrb[0].mxu0 %v1257_v24 }
  0x5c   :  { %985 = vmatpush3.bf16.msra.mxu1 %v984_v7  ;;  %1021 = vmatpush3.bf16.msra.mxu0 %v1240_v13 }
  0x5d   :  { %986 = vmatprep.subr.bf16.mxu1 %v1161_v0  ;;  %1022 = vmatprep.subr.bf16.mxu0 %v1161_v0 }
  0x5e   :  { %899 = vmatprep.mubr.msk.f32.mxu1 %vm1162_vm0, %v1163_v1  ;;  %956 = vmatprep.mubr.msk.f32.mxu0 %vm1162_vm0, %v1163_v1  ;;  %v1164_v1 = vmov 1966171168  }
  0x5f   :  { %v618_v11 = vunpack.c.l.s4 %v1164_v1 }
  0x60   :  { %988 = vmatpush3.bf16.msra.mxu1 %v987_v8  ;;  %1024 = vmatpush3.bf16.msra.mxu0 %v1252_v22 }
  0x61   :  { %989 = vmatprep.subr.bf16.mxu1 %v1161_v0  ;;  %1025 = vmatprep.subr.bf16.mxu0 %v1161_v0  ;;  %v619_v13 = vunpack.c.0.s8 %v618_v11 }
  0x63   :  { %v622_v18 = vsub.s32 %v619_v13, %v1342_v14 }
  0x64   :  { %991 = vmatpush3.bf16.msra.mxu1 %v990_v9  ;;  %1027 = vmatpush3.bf16.msra.mxu0 %v1261_v27 }
  0x65   :  { %992 = vmatprep.subr.bf16.mxu1 %v1161_v0  ;;  %1028 = vmatprep.subr.bf16.mxu0 %v1161_v0 }
  0x68   :  { %994 = vmatpush3.bf16.msra.mxu1 %v993_v10  ;;  %1030 = vmatpush3.bf16.msra.mxu0 %v1279_v38 }
  0x6b   :  { %900 = vmatmul.mubr.f32.vlgmr.msra.gmra.mrb[0].mxu1 %v1266_v31  ;;  %957 = vmatmul.mubr.f32.vlgmr.msra.gmra.mrb[0].mxu0 %v1257_v24 }
 0x13e   :  { %v355_v16 = vpop.f32.mrb[0].mxu1  ;;  %v610_v17 = vpop.f32.mrb[0].mxu0 }
 0x13f   :  { %v1031_v0 = vadd.f32 %v790_v15, %v355_v16  ;;  %v901_v19 = vpop.f32.mrb[1].mxu1  ;;  %v958_v20 = vpop.f32.mrb[1].mxu0  ;;  %v759_v15 = vadd.s32 4294967232, %v660_v35 }
 0x141   :  { %v1032_v21 = vadd.f32 %v1031_v0, %v610_v17 }
 0x143   :  { %v623_v22 = vrot.slane %v1032_v21, %v622_v18 }
 0x145   :  { %v624_v24 = vcombine.high %v623_v22, %v623_v22  ;;  %v631_v25 = vrot.slane %v623_v22, %v622_v18 }
 0x147   :  { %v642_v27 = vrot.slane %v631_v25, %v641_v23  ;;  %v638_v28 = vrot.slane %v624_v24, %v622_v18  ;;  %v762_v18 = vsub.s32 %v759_v15, %v1342_v14 }
 0x149   :  { %v649_v30 = vmul.f32 %v642_v27, %v614_v26  ;;  %v646_v31 = vrot.slane %v638_v28, %v641_v23 }
 0x14b   :  { %v651_v32 = vsel %vm73_vm1, %v649_v30, 0.0  ;;  %v650_v33 = vmul.f32 %v646_v31, %v615_v29 }
 0x14c   :  { %652 = vadd.xlane.f32.xlu0 %v651_v32 }
 0x14d   :  { %v654_v34 = vsel %vm73_vm1, %v650_v33, 0.0 }
 0x150   :  { %655 = vadd.xlane.f32.xlu0 %v654_v34 }
 0x1d9   :  { %v653_v36 = vpop.xlane.xlu0 %652 }
 0x1da   :  { %v664_v39 = vrot.slane %v653_v36, %v663_v37 }
 0x1dd   :  { %v656_v38 = vpop.xlane.xlu0 %655 }
 0x1de   :  { %v668_v40 = vrot.slane %v656_v38, %v663_v37 }
 0x1e0   :  { %v670_v41 = vsel %vm669_vm2, %v668_v40, %v664_v39 }
 0x1e1   :  { %v673_v42 = vsel %vm672_vm3, %v670_v41, -inf }
 0x1e2   :  { %674 = vmax.xlane.f32.xlu1 %v673_v42 }
 0x26f   :  { %v675_v45 = vpop.xlane.xlu1 %674 }
 0x270   :  { %v680_v46 = vrot.slane %v675_v45, %v641_v23  ;;  %v684_v47 = vrot.slane %v675_v45, %v683_v44 }
 0x272   :  { %v687_v48 = vsub.f32 %v653_v36, %v680_v46  ;;  %v688_v49 = vsub.f32 %v656_v38, %v684_v47 }
 0x274   :  { %v689_v50 = vmul.f32 1.442695, %v687_v48  ;;  %v691_v51 = vmul.f32 1.442695, %v688_v49 }
 0x276   :  { %1054 = vpow2.f32 %v689_v50 }
 0x277   :  { %1056 = vpow2.f32 %v691_v51 }
 0x280   :  { %v1055_v52 = vpop.eup %1054 }
 0x281   :  { %v1057_v53 = vpop.eup %1056  ;;  %696 = vperm.xlu1 %1052, %v1055_v52  }
 0x282   :  { %699 = vperm.xlu0 %1053, %v1057_v53  }
 0x300   :  { %v697_v54 = vpop.permute.xlu1 %696 }
 0x301   :  { %v700_v55 = vpop.permute.xlu0 %699  ;;  %v704_v56 = vrot.slane %v697_v54, %v663_v37 }
 0x302   :  { %v708_v57 = vrot.slane %v700_v55, %v663_v37 }
 0x304   :  { %v709_v58 = vsel %vm669_vm2, %v708_v57, %v704_v56 }
 0x305   :  { %v711_v59 = vsel %vm672_vm3, %v709_v58, 0.0 }
 0x306   :  { %712 = vadd.xlane.f32.xlu1 %v711_v59 }
 0x393   :  { %v713_v60 = vpop.xlane.xlu1 %712 }
 0x394   :  { %v718_v61 = vrot.slane %v713_v60, %v641_v23  ;;  %v722_v62 = vrot.slane %v713_v60, %v683_v44 }
 0x396   :  { %1058 = vrcp.f32 %v718_v61 }
 0x397   :  { %1060 = vrcp.f32 %v722_v62 }
 0x3a0   :  { %v1059_v63 = vpop.eup %1058 }
 0x3a1   :  { %v726_v2 = vmul.f32 %v1059_v63, %v1055_v52  ;;  %v1061_v3 = vpop.eup %1060 }
 0x3a2   :  { %v728_v4 = vmul.f32 %v1061_v3, %v1057_v53 }
 0x3a3   :  { %731 = vperm.xlu0 %1053, %v726_v2  }
 0x3a7   :  { %736 = vperm.xlu0 %1053, %v728_v4  }
 0x422   :  { %v732_v5 = vpop.permute.xlu0 %731 }
 0x423   :  { %v739_v6 = vmul.f32 %v732_v5, %v614_v26  ;;  %v763_v24 = vrot.slane %v732_v5, %v762_v18 }
 0x425   :  { %v741_v7 = vsel %vm73_vm1, %v739_v6, 0.0 }
 0x426   :  { %v742_v8 = vrot.slane %v741_v7, 4  ;;  %v737_v9 = vpop.permute.xlu0 %736 }
 0x427   :  { %v740_v10 = vmul.f32 %v737_v9, %v615_v29  ;;  %v767_v22 = vrot.slane %v737_v9, %v762_v18 }
 0x428   :  { %v743_v1 = vadd.f32 %v742_v8, %v741_v7 }
 0x429   :  { %v748_v11 = vsel %vm73_vm1, %v740_v10, 0.0  ;;  %v768_v26 = vsel %vm669_vm2, %v767_v22, %v763_v24 }
 0x42a   :  { %v744_v12 = vrot.slane %v743_v1, 2  ;;  %v749_v13 = vrot.slane %v748_v11, 4 }
 0x42c   :  { %v745_v16 = vadd.f32 %v744_v12, %v743_v1  ;;  %v750_v17 = vadd.f32 %v749_v13, %v748_v11 }
 0x42e   :  { %v751_v0 = vrot.slane %v750_v17, 2  ;;  %v746_v19 = vrot.slane %v745_v16, 1 }
 0x430   :  { %v752_v20 = vadd.f32 %v751_v0, %v750_v17  ;;  %v747_v23 = vadd.f32 %v746_v19, %v745_v16 }
 0x432   :  { %v753_v21 = vrot.slane %v752_v20, 1 }
 0x434   :  { %v754_v25 = vadd.f32 %v753_v21, %v752_v20 }
 0x436   :  { %v757_v27 = vsel %vm669_vm2, %v754_v25, %v747_v23 }
 0x437   :  { %v770_v28 = vsel %vm73_vm1, %v757_v27, %v768_v26 }
 0x438   :  { %v772_v29 = vsel %vm771_vm4, %v770_v28, 0.0 }
 0x439   :  { %773 = vst [vmem:[#allocation8] sm:$0x3] %v772_v29 }
 0x43a   :  { %1139 = shalt.err (!%p1136_p0)
}
 0x43b   :  { %s1140_s30 = scalar_lea.hbm %s1379_s4, 32 }
 0x43c   :  { %p1141_p1 = scmp.ne.s32.totalorder %s1379_s4, %s1140_s30  ;;  %p1144_p2 = scmp.lt.u32.totalorder %s1140_s30, %s1379_s4 }
 0x43e   :  { %p1146_p3 = pnand %p1144_p2, %p1141_p1 }
 0x440   :  { %1149 = shalt.err (!%p1146_p3)
}
 0x441   :  { %783 = dma.vmem_to_hbm [thread:$0]  %s781_s26, 32, %s1379_s4, [#allocation4]  }
 0x442   :  { %1154 = dma.done.wait [#allocation4], 32  }
 0x443   :  { %1155 = vsyncadd [#allocation4], 4294967264 }
 0x444   :  { %787 = vsyncpa [#allocation3], 1 }
 0x445   :  { %788 = vsyncpa [#allocation6], 1 }
 0x446   :  { %789 = vsyncpa [#allocation4], 1 }

</bundles_post_ra>
